<compile_context>
chip_gen: v7x
topology: tpu7x:2x2x1
jax: 0.10.0
libtpu: 0.0.40
codegen_flags: <defaults>
</compile_context>

<pallas_src>
import jax
import jax.numpy as jnp
from jax.experimental import pallas as pl
from jax.experimental.pallas import tpu as pltpu


def _round_up(x, m):
    return (x + m - 1) // m * m


def mlp_kernel(x_ref, w1_ref, b1_ref, w2_ref, b2_ref, w3_ref, b3_ref, o_ref):
    # x_ref: (TB, NS_PAD) bf16; weights bf16 (in, out); biases f32 (1, out).
    # MXU matmuls with f32 accumulation; bias add + relu in f32 on the VPU;
    # single downcast at the (lane-dense, 128-wide) output store.
    x = x_ref[...]
    h1 = jnp.dot(x, w1_ref[...], preferred_element_type=jnp.float32)
    h1 = jnp.maximum(h1 + b1_ref[...], 0.0)
    h2 = jnp.dot(h1.astype(jnp.bfloat16), w2_ref[...],
                 preferred_element_type=jnp.float32)
    h2 = jnp.maximum(h2 + b2_ref[...], 0.0)
    out = jnp.dot(h2.astype(jnp.bfloat16), w3_ref[...],
                  preferred_element_type=jnp.float32)
    o_ref[...] = (out + b3_ref[...]).astype(o_ref.dtype)


def net_forward(x, params, na, *, tile_b=512):
    """Pallas forward pass of Net. x: (B, ns) f32. Returns (B, na) f32."""
    w1, b1, w2, b2, w3, b3 = params
    B, ns = x.shape
    ns_pad = w1.shape[0]
    h_pad = w1.shape[1]
    na_pad = w3.shape[1]

    # Batch tile: >=512 rows when B is large, clamped (multiple of 8) when small.
    TB = min(tile_b, _round_up(B, 8))
    B_pad = _round_up(B, TB)

    # Pad batch rows / feature lanes with zeros, cast activations to bf16.
    x_p = jnp.zeros((B_pad, ns_pad), jnp.bfloat16)
    x_p = x_p.at[:B, :ns].set(x.astype(jnp.bfloat16))

    grid = (B_pad // TB,)

    out = pl.pallas_call(
        mlp_kernel,
        out_shape=jax.ShapeDtypeStruct((B_pad, na_pad), jnp.float32),
        grid_spec=pltpu.PrefetchScalarGridSpec(
            num_scalar_prefetch=0,
            grid=grid,
            in_specs=[
                pl.BlockSpec((TB, ns_pad), lambda i: (i, 0)),      # x tile
                pl.BlockSpec((ns_pad, h_pad), lambda i: (0, 0)),   # w1 (resident)
                pl.BlockSpec((1, h_pad), lambda i: (0, 0)),        # b1
                pl.BlockSpec((h_pad, h_pad), lambda i: (0, 0)),    # w2
                pl.BlockSpec((1, h_pad), lambda i: (0, 0)),        # b2
                pl.BlockSpec((h_pad, na_pad), lambda i: (0, 0)),   # w3
                pl.BlockSpec((1, na_pad), lambda i: (0, 0)),       # b3
            ],
            out_specs=pl.BlockSpec((TB, na_pad), lambda i: (i, 0)),
        ),
        compiler_params=pltpu.CompilerParams(
            # Batch tiles are independent -> shard across TensorCores on v7x.
            dimension_semantics=("parallel",),
        ),
    )(x_p, w1, b1, w2, b2, w3, b3)

    return out[:B, :na]


def init_params(key, ns, na, hidden=30, *, hidden_pad=128, na_pad=128):
    """PyTorch-Linear-style init (uniform +-1/sqrt(fan_in)), stored padded.

    Weights are (in, out) — transposed vs torch's (out, in) — zero-padded to
    (8,128)-friendly shapes and cast to bf16; biases stay f32 as (1, out_pad).
    Zero padding keeps the math on the real slice identical.
    """
    ns_pad = _round_up(max(ns, 8), 8)
    ks = jax.random.split(key, 6)

    def linear(kw, kb, fan_in, fan_out, fan_in_pad, fan_out_pad):
        bound = 1.0 / float(fan_in) ** 0.5
        w = jax.random.uniform(kw, (fan_in, fan_out), jnp.float32, -bound, bound)
        b = jax.random.uniform(kb, (fan_out,), jnp.float32, -bound, bound)
        w_p = jnp.zeros((fan_in_pad, fan_out_pad), jnp.float32)
        w_p = w_p.at[:fan_in, :fan_out].set(w).astype(jnp.bfloat16)
        b_p = jnp.zeros((1, fan_out_pad), jnp.float32)
        b_p = b_p.at[0, :fan_out].set(b)
        return w_p, b_p

    w1, b1 = linear(ks[0], ks[1], ns, hidden, ns_pad, hidden_pad)
    w2, b2 = linear(ks[2], ks[3], hidden, hidden, hidden_pad, hidden_pad)
    w3, b3 = linear(ks[4], ks[5], hidden, na, hidden_pad, na_pad)
    return (w1, b1, w2, b2, w3, b3)


def reference(x, params, na):
    """Pure-JAX mirror of the kernel math (bf16 MXU inputs, f32 accumulate)."""
    w1, b1, w2, b2, w3, b3 = params
    ns = x.shape[1]
    xb = x.astype(jnp.bfloat16)
    h1 = jnp.maximum(
        jnp.dot(xb, w1[:ns], preferred_element_type=jnp.float32) + b1, 0.0)
    h2 = jnp.maximum(
        jnp.dot(h1.astype(jnp.bfloat16), w2,
                preferred_element_type=jnp.float32) + b2, 0.0)
    o = jnp.dot(h2.astype(jnp.bfloat16), w3,
                preferred_element_type=jnp.float32) + b3
    return o[:, :na]


if __name__ == "__main__":
    ns, na = 4, 2  # DQN-style: state dim 4, 2 actions (hidden = 30 as in Net)

    key = jax.random.PRNGKey(0)
    k_x1, k_x2, k_p = jax.random.split(key, 3)
    params = init_params(k_p, ns, na)

    # Small case (single tile, exercises clamped TB).
    x_small = jax.random.normal(k_x1, (8, ns), jnp.float32)
    out_small = jax.block_until_ready(net_forward(x_small, params, na))
    ref_small = reference(x_small, params, na)
    assert out_small.shape == (8, na)
    assert jnp.allclose(out_small, ref_small, atol=1e-4, rtol=1e-4)

    # Larger case (multiple 512-row tiles + batch padding, parallel grid axis).
    x_big = jax.random.normal(k_x2, (600, ns), jnp.float32)
    out_big = jax.block_until_ready(net_forward(x_big, params, na))
    ref_big = reference(x_big, params, na)
    assert out_big.shape == (600, na)
    assert jnp.allclose(out_big, ref_big, atol=1e-4, rtol=1e-4)

    print("KERNEL_OK")
</pallas_src>

<mosaic_0001>
module attributes {stable_mosaic.version = 11 : i64} {
  func.func @mlp_kernel(%arg0: i32, %arg1: memref<8x8xbf16, #tpu.memory_space<vmem>>, %arg2: memref<8x128xbf16, #tpu.memory_space<vmem>>, %arg3: memref<1x128xf32, #tpu.memory_space<vmem>>, %arg4: memref<128x128xbf16, #tpu.memory_space<vmem>>, %arg5: memref<1x128xf32, #tpu.memory_space<vmem>>, %arg6: memref<128x128xbf16, #tpu.memory_space<vmem>>, %arg7: memref<1x128xf32, #tpu.memory_space<vmem>>, %arg8: memref<8x128xf32, #tpu.memory_space<vmem>>) attributes {dimension_semantics = [#tpu.dimension_semantics<parallel>], iteration_bounds = array<i64: 1>, scalar_prefetch = 0 : i64, scratch_operands = 0 : i64, tpu.core_type = #tpu.core_type<tc>, window_params = [{transform_indices = @transform_0, window_bounds = array<i64: 8, 8>}, {pipeline_mode = #tpu.pipeline_mode<synchronous>, transform_indices = @transform_1, window_bounds = array<i64: 8, 128>}, {pipeline_mode = #tpu.pipeline_mode<synchronous>, transform_indices = @transform_2, window_bounds = array<i64: 1, 128>}, {pipeline_mode = #tpu.pipeline_mode<synchronous>, transform_indices = @transform_3, window_bounds = array<i64: 128, 128>}, {pipeline_mode = #tpu.pipeline_mode<synchronous>, transform_indices = @transform_4, window_bounds = array<i64: 1, 128>}, {pipeline_mode = #tpu.pipeline_mode<synchronous>, transform_indices = @transform_5, window_bounds = array<i64: 128, 128>}, {pipeline_mode = #tpu.pipeline_mode<synchronous>, transform_indices = @transform_6, window_bounds = array<i64: 1, 128>}, {transform_indices = @transform_7, window_bounds = array<i64: 8, 128>}]} {
    %c0 = arith.constant 0 : index
    %c0_0 = arith.constant 0 : index
    %0 = vector.load %arg1[%c0, %c0_0] : memref<8x8xbf16, #tpu.memory_space<vmem>>, vector<8x8xbf16>
    %c0_1 = arith.constant 0 : index
    %c0_2 = arith.constant 0 : index
    %1 = vector.load %arg2[%c0_1, %c0_2] : memref<8x128xbf16, #tpu.memory_space<vmem>>, vector<8x128xbf16>
    %cst = arith.constant dense<0.000000e+00> : vector<8x128xf32>
    %2 = tpu.matmul %0, %1, %cst {dimension_numbers = #tpu.dot_dimension_numbers<[1], [0], [0], [1], [0, 0, 1, 1], [], []>} : vector<8x8xbf16>, vector<8x128xbf16>, vector<8x128xf32> -> vector<8x128xf32>
    %c0_3 = arith.constant 0 : index
    %c0_4 = arith.constant 0 : index
    %3 = vector.load %arg3[%c0_3, %c0_4] : memref<1x128xf32, #tpu.memory_space<vmem>>, vector<1x128xf32>
    %4 = vector.broadcast %3 : vector<1x128xf32> to vector<8x128xf32>
    %5 = arith.addf %2, %4 : vector<8x128xf32>
    %cst_5 = arith.constant 0.000000e+00 : f32
    %6 = vector.broadcast %cst_5 : f32 to vector<8x128xf32>
    %7 = arith.maximumf %5, %6 : vector<8x128xf32>
    %8 = arith.truncf %7 : vector<8x128xf32> to vector<8x128xbf16>
    %c0_6 = arith.constant 0 : index
    %c0_7 = arith.constant 0 : index
    %9 = vector.load %arg4[%c0_6, %c0_7] : memref<128x128xbf16, #tpu.memory_space<vmem>>, vector<128x128xbf16>
    %cst_8 = arith.constant dense<0.000000e+00> : vector<8x128xf32>
    %10 = tpu.matmul %8, %9, %cst_8 {dimension_numbers = #tpu.dot_dimension_numbers<[1], [0], [0], [1], [0, 0, 1, 1], [], []>} : vector<8x128xbf16>, vector<128x128xbf16>, vector<8x128xf32> -> vector<8x128xf32>
    %c0_9 = arith.constant 0 : index
    %c0_10 = arith.constant 0 : index
    %11 = vector.load %arg5[%c0_9, %c0_10] : memref<1x128xf32, #tpu.memory_space<vmem>>, vector<1x128xf32>
    %12 = vector.broadcast %11 : vector<1x128xf32> to vector<8x128xf32>
    %13 = arith.addf %10, %12 : vector<8x128xf32>
    %cst_11 = arith.constant 0.000000e+00 : f32
    %14 = vector.broadcast %cst_11 : f32 to vector<8x128xf32>
    %15 = arith.maximumf %13, %14 : vector<8x128xf32>
    %16 = arith.truncf %15 : vector<8x128xf32> to vector<8x128xbf16>
    %c0_12 = arith.constant 0 : index
    %c0_13 = arith.constant 0 : index
    %17 = vector.load %arg6[%c0_12, %c0_13] : memref<128x128xbf16, #tpu.memory_space<vmem>>, vector<128x128xbf16>
    %cst_14 = arith.constant dense<0.000000e+00> : vector<8x128xf32>
    %18 = tpu.matmul %16, %17, %cst_14 {dimension_numbers = #tpu.dot_dimension_numbers<[1], [0], [0], [1], [0, 0, 1, 1], [], []>} : vector<8x128xbf16>, vector<128x128xbf16>, vector<8x128xf32> -> vector<8x128xf32>
    %c0_15 = arith.constant 0 : index
    %c0_16 = arith.constant 0 : index
    %19 = vector.load %arg7[%c0_15, %c0_16] : memref<1x128xf32, #tpu.memory_space<vmem>>, vector<1x128xf32>
    %20 = vector.broadcast %19 : vector<1x128xf32> to vector<8x128xf32>
    %21 = arith.addf %18, %20 : vector<8x128xf32>
    %c0_17 = arith.constant 0 : index
    %c0_18 = arith.constant 0 : index
    %22 = vector.load %arg8[%c0_17, %c0_18] : memref<8x128xf32, #tpu.memory_space<vmem>>, vector<8x128xf32>
    tpu.vector_store %arg8[%c0_17, %c0_18], %21 {strides = array<i32>} : memref<8x128xf32, #tpu.memory_space<vmem>>, vector<8x128xf32>,
    return
  }
  func.func @transform_0(%arg0: i32) -> (i32, i32) {
    %c0_i32 = arith.constant 0 : i32
    %c0_i32_0 = arith.constant 0 : i32
    return %arg0, %c0_i32 : i32, i32
  }
  func.func @transform_1(%arg0: i32) -> (i32, i32) {
    %c0_i32 = arith.constant 0 : i32
    %c0_i32_0 = arith.constant 0 : i32
    %c0_i32_1 = arith.constant 0 : i32
    return %c0_i32, %c0_i32_0 : i32, i32
  }
  func.func @transform_2(%arg0: i32) -> (i32, i32) {
    %c0_i32 = arith.constant 0 : i32
    %c0_i32_0 = arith.constant 0 : i32
    %c0_i32_1 = arith.constant 0 : i32
    return %c0_i32, %c0_i32_0 : i32, i32
  }
  func.func @transform_3(%arg0: i32) -> (i32, i32) {
    %c0_i32 = arith.constant 0 : i32
    %c0_i32_0 = arith.constant 0 : i32
    %c0_i32_1 = arith.constant 0 : i32
    return %c0_i32, %c0_i32_0 : i32, i32
  }
  func.func @transform_4(%arg0: i32) -> (i32, i32) {
    %c0_i32 = arith.constant 0 : i32
    %c0_i32_0 = arith.constant 0 : i32
    %c0_i32_1 = arith.constant 0 : i32
    return %c0_i32, %c0_i32_0 : i32, i32
  }
  func.func @transform_5(%arg0: i32) -> (i32, i32) {
    %c0_i32 = arith.constant 0 : i32
    %c0_i32_0 = arith.constant 0 : i32
    %c0_i32_1 = arith.constant 0 : i32
    return %c0_i32, %c0_i32_0 : i32, i32
  }
  func.func @transform_6(%arg0: i32) -> (i32, i32) {
    %c0_i32 = arith.constant 0 : i32
    %c0_i32_0 = arith.constant 0 : i32
    %c0_i32_1 = arith.constant 0 : i32
    return %c0_i32, %c0_i32_0 : i32, i32
  }
  func.func @transform_7(%arg0: i32) -> (i32, i32) {
    %c0_i32 = arith.constant 0 : i32
    %c0_i32_0 = arith.constant 0 : i32
    return %arg0, %c0_i32 : i32, i32
  }
}

</mosaic_0001>

<bundles_post_ra>
// kernel: tpu_custom_call.1
= control target key start
LH: loop header
LB: loop body
LE: loop exit
PB: predicated region body
PF: predicated region fallthrough
CT: control target
= control target key end

     0   :  { %12 = vsyncpa [#allocation3], 0  ;;  %s750_s0 = inlined_call_operand.hbm [shape: bf16[8,8], index: 0, kind: input, shape index: {}]   ;;  %s751_s1 = inlined_call_operand.hbm [shape: bf16[8,128], index: 1, kind: input, shape index: {}]   ;;  %s752_s2 = inlined_call_operand.vmem [shape: f32[1,128], index: 2, kind: input, shape index: {}]   ;;  %s753_s3 = inlined_call_operand.hbm [shape: bf16[128,128], index: 3, kind: input, shape index: {}]   ;;  %s754_s4 = inlined_call_operand.vmem [shape: f32[1,128], index: 4, kind: input, shape index: {}]   ;;  %s755_s5 = inlined_call_operand.hbm [shape: bf16[128,128], index: 5, kind: input, shape index: {}]   ;;  %s756_s6 = inlined_call_operand.vmem [shape: f32[1,128], index: 6, kind: input, shape index: {}]   ;;  %s757_s7 = inlined_call_operand.hbm [shape: f32[8,128], index: 7, kind: output, shape index: {}]  }
   0x1   :  { %13 = vsyncpa [#allocation6], 0 }
   0x2   :  { %14 = vsyncpa [#allocation9], 0 }
   0x3   :  { %15 = vsyncpa [#allocation4], 0  ;;  %s609_s24 = smov [#allocation5]   ;;  %s610_s26 = smov [#allocation2]  }
   0x4   :  { %s32_s25 = sshll.u32 %s609_s24, 4  ;;  %s22_s27 = sshll.u32 %s610_s26, 4  ;;  %s33_s25 = int_to_ptr.vmem [resolvable:$true] %s32_s25  ;;  %s23_s27 = int_to_ptr.vmem [resolvable:$true] %s22_s27 }
   0x5   :  { %s491_s30 = scalar_lea.hbm %s751_s1, 64 }
   0x6   :  { %p492_p0 = scmp.ne.s32.totalorder %s751_s1, %s491_s30  ;;  %p495_p1 = scmp.lt.u32.totalorder %s491_s30, %s751_s1 }
   0x8   :  { %p497_p2 = pnand %p495_p1, %p492_p0 }
   0xa   :  { %500 = shalt.err (!%p497_p2)
}
   0xb   :  { %s501_s12 = scalar_lea.vmem %s33_s25, 64  ;;  %p506_p4 = scmp.lt.s32.totalorder %s33_s25, %s33_s25 }
   0xc   :  { %p502_p3 = scmp.ne.s32.totalorder %s33_s25, %s501_s12  ;;  %p507_p5 = scmp.lt.s32.totalorder %s501_s12, %s501_s12 }
   0xe   :  { %p508_p6 = por %p507_p5, %p506_p4 }
  0x10   :  { %p509_p7 = pnand %p508_p6, %p502_p3 }
  0x12   :  { %512 = shalt.err (!%p509_p7)
}
  0x13   :  { %35 = dma.hbm_to_vmem [thread:$0]  %s751_s1, 64, %s33_s25, [#allocation6]  }
  0x14   :  { %s513_s17 = scalar_lea.hbm %s750_s0, 64 }
  0x15   :  { %p514_p8 = scmp.ne.s32.totalorder %s750_s0, %s513_s17  ;;  %p517_p9 = scmp.lt.u32.totalorder %s513_s17, %s750_s0 }
  0x17   :  { %p519_p10 = pnand %p517_p9, %p514_p8 }
  0x19   :  { %522 = shalt.err (!%p519_p10)
}
  0x1a   :  { %s523_s22 = scalar_lea.vmem %s23_s27, 64  ;;  %p528_p12 = scmp.lt.s32.totalorder %s23_s27, %s23_s27 }
  0x1b   :  { %p524_p11 = scmp.ne.s32.totalorder %s23_s27, %s523_s22  ;;  %p529_p13 = scmp.lt.s32.totalorder %s523_s22, %s523_s22 }
  0x1d   :  { %p530_p0 = por %p529_p13, %p528_p12 }
  0x1f   :  { %p531_p1 = pnand %p530_p0, %p524_p11 }
  0x21   :  { %534 = shalt.err (!%p531_p1)
}
  0x22   :  { %25 = dma.hbm_to_vmem [thread:$0]  %s750_s0, 64, %s23_s27, [#allocation3]  }
  0x23   :  { %s611_s24 = smov [#allocation7]   ;;  %s535_s29 = scalar_lea.hbm %s753_s3, 1024 }
  0x24   :  { %s43_s25 = sshll.u32 %s611_s24, 4  ;;  %p536_p2 = scmp.ne.s32.totalorder %s753_s3, %s535_s29  ;;  %s44_s25 = int_to_ptr.vmem [resolvable:$true] %s43_s25 }
  0x25   :  { %p539_p3 = scmp.lt.u32.totalorder %s535_s29, %s753_s3 }
  0x27   :  { %p541_p4 = pnand %p539_p3, %p536_p2 }
  0x29   :  { %544 = shalt.err (!%p541_p4)
}
  0x2a   :  { %s545_s11 = scalar_lea.vmem %s44_s25, 1024  ;;  %p550_p6 = scmp.lt.s32.totalorder %s44_s25, %s44_s25 }
  0x2b   :  { %p546_p5 = scmp.ne.s32.totalorder %s44_s25, %s545_s11  ;;  %p551_p7 = scmp.lt.s32.totalorder %s545_s11, %s545_s11 }
  0x2d   :  { %p552_p8 = por %p551_p7, %p550_p6 }
  0x2f   :  { %p553_p9 = pnand %p552_p8, %p546_p5 }
  0x31   :  { %556 = shalt.err (!%p553_p9)
}
  0x32   :  { %s612_s0 = smov 64   ;;  %s613_s27 = smov 4  }
  0x33   :  { %49 = dma.hbm_to_vmem [thread:$0]  %s753_s3, 1024, %s44_s25, [#allocation6], %s612_s0, %s612_s0, %s613_s27  }
  0x34   :  { %s614_s14 = smov [#allocation8]   ;;  %s557_s18 = scalar_lea.hbm %s755_s5, 1024 }
  0x35   :  { %s57_s15 = sshll.u32 %s614_s14, 4  ;;  %p558_p10 = scmp.ne.s32.totalorder %s755_s5, %s557_s18  ;;  %s58_s15 = int_to_ptr.vmem [resolvable:$true] %s57_s15 }
  0x36   :  { %p561_p11 = scmp.lt.u32.totalorder %s557_s18, %s755_s5 }
  0x38   :  { %p563_p12 = pnand %p561_p11, %p558_p10 }
  0x3a   :  { %566 = shalt.err (!%p563_p12)
}
  0x3b   :  { %s567_s1 = scalar_lea.vmem %s58_s15, 1024  ;;  %p572_p0 = scmp.lt.s32.totalorder %s58_s15, %s58_s15 }
  0x3c   :  { %p568_p13 = scmp.ne.s32.totalorder %s58_s15, %s567_s1  ;;  %p573_p1 = scmp.lt.s32.totalorder %s567_s1, %s567_s1 }
  0x3e   :  { %p574_p2 = por %p573_p1, %p572_p0 }
  0x40   :  { %p575_p3 = pnand %p574_p2, %p568_p13 }
  0x42   :  { %578 = shalt.err (!%p575_p3)
}
  0x43   :  { %63 = dma.hbm_to_vmem [thread:$0]  %s755_s5, 1024, %s58_s15, [#allocation9], %s612_s0, %s612_s0, %s613_s27  }
  0x44   :  { %601 = dma.done.wait [#allocation3], 64  }
  0x45   :  { %602 = vsyncadd [#allocation3], 4294967232 }
  0x46   :  { %603 = dma.done.wait [#allocation6], 1088  }
  0x47   :  { %604 = vsyncadd [#allocation6], 4294966208 }
  0x48   :  { %605 = dma.done.wait [#allocation9], 1024  }
  0x49   :  { %606 = vsyncadd [#allocation9], 4294966272  ;;  %v615_v0 = vmov 0.0   ;;  %vm616_vm0 = vmmov 0   ;;  %vm92_vm1 = vcmask 1043456   ;;  %vm88_vm2 = vcmask 64512  }
  0x4a   :  { %420 = vmatprep.subr.bf16.mxu0 %v615_v0  ;;  %422 = vmatprep.mubr.msk.bf16.mxu0 %vm616_vm0, %v615_v0  ;;  %v80_v1 = vld [vmem:[#allocation5] sm:$0xf]  ;;  %v475_v3 = vld [vmem:[#allocation7] sm:$0xff]   ;;  %v79_v4 = vld [vmem:[#allocation2] sm:$0xf]  ;;  %s617_s29 = smov [#allocation10]  }
  0x4b   :  { %426 = vmatprep.subr.bf16.mxu1 %v615_v0  ;;  %442 = vmatprep.mubr.msk.bf16.mxu1 %vm616_vm0, %v615_v0  ;;  %v94_v2 = vsel %vm92_vm1, %v80_v1, 0  ;;  %v476_v5 = vld [vmem:[#allocation7 + $0x8] sm:$0xff]   ;;  %v477_v6 = vld [vmem:[#allocation7 + $0x10] sm:$0xff]   ;;  %v478_v7 = vld [vmem:[#allocation7 + $0x18] sm:$0xff]   ;;  %s369_s30 = sshll.u32 %s617_s29, 4  ;;  %s370_s30 = int_to_ptr.vmem [resolvable:$true] %s369_s30 }
  0x4c   :  { %421 = vmatpush3.bf16.msra.mxu0 %v94_v2  ;;  %427 = vmatpush3.bf16.msra.mxu1 %v475_v3  ;;  %v479_v8 = vld [vmem:[#allocation7 + $0x20] sm:$0xff]   ;;  %v480_v9 = vld [vmem:[#allocation7 + $0x28] sm:$0xff]   ;;  %v481_v10 = vld [vmem:[#allocation7 + $0x30] sm:$0xff]   ;;  %p584_p5 = scmp.lt.s32.totalorder %s370_s30, %s370_s30 }
  0x4d   :  { %446 = vmatprep.subr.bf16.mxu0 %v615_v0  ;;  %428 = vmatprep.subr.bf16.mxu1 %v615_v0  ;;  %v482_v11 = vld [vmem:[#allocation7 + $0x38] sm:$0xff]   ;;  %v483_v12 = vld [vmem:[#allocation8] sm:$0xff]   ;;  %v484_v13 = vld [vmem:[#allocation8 + $0x8] sm:$0xff]  }
  0x4e   :  { %v485_v14 = vld [vmem:[#allocation8 + $0x10] sm:$0xff]   ;;  %v486_v15 = vld [vmem:[#allocation8 + $0x18] sm:$0xff]   ;;  %v487_v16 = vld [vmem:[#allocation8 + $0x20] sm:$0xff]  }
  0x4f   :  { %423 = vmatmul.mubr.msk.bf16.vlgmr.msra.gmra.mrb[0].mxu0 %vm88_vm2, %v79_v4  ;;  %v488_v17 = vld [vmem:[#allocation8 + $0x28] sm:$0xff]   ;;  %v380_v18 = vld [vmem:[%s752_s2] ss:$0 sm:$0xff]  ;;  %v489_v26 = vld [vmem:[#allocation8 + $0x30] sm:$0xff]  }
  0x50   :  { %462 = vmatprep.mubr.msk.bf16.mxu0 %vm616_vm0, %v615_v0  ;;  %429 = vmatpush3.bf16.msra.mxu1 %v476_v5  ;;  %v490_v27 = vld [vmem:[#allocation8 + $0x38] sm:$0xff]  }
  0x51   :  { %430 = vmatprep.subr.bf16.mxu1 %v615_v0  ;;  %447 = vmatpush3.bf16.msra.mxu0 %v483_v12  ;;  %v382_v28 = vld [vmem:[%s754_s4] ss:$0 sm:$0xff]  ;;  %s579_s4 = scalar_lea.vmem %s370_s30, 128 }
  0x52   :  { %448 = vmatprep.subr.bf16.mxu0 %v615_v0  ;;  %v391_v36 = vld [vmem:[%s756_s6] ss:$0 sm:$0xff]  ;;  %p580_p4 = scmp.ne.s32.totalorder %s370_s30, %s579_s4  ;;  %p585_p6 = scmp.lt.s32.totalorder %s579_s4, %s579_s4 }
  0x54   :  { %431 = vmatpush3.bf16.msra.mxu1 %v477_v6  ;;  %p586_p7 = por %p585_p6, %p584_p5 }
  0x55   :  { %432 = vmatprep.subr.bf16.mxu1 %v615_v0  ;;  %449 = vmatpush3.bf16.msra.mxu0 %v484_v13 }
  0x56   :  { %450 = vmatprep.subr.bf16.mxu0 %v615_v0  ;;  %p587_p8 = pnand %p586_p7, %p580_p4 }
  0x58   :  { %433 = vmatpush3.bf16.msra.mxu1 %v478_v7 }
  0x59   :  { %434 = vmatprep.subr.bf16.mxu1 %v615_v0  ;;  %451 = vmatpush3.bf16.msra.mxu0 %v485_v14 }
  0x5a   :  { %452 = vmatprep.subr.bf16.mxu0 %v615_v0 }
  0x5c   :  { %435 = vmatpush3.bf16.msra.mxu1 %v479_v8 }
  0x5d   :  { %436 = vmatprep.subr.bf16.mxu1 %v615_v0  ;;  %453 = vmatpush3.bf16.msra.mxu0 %v486_v15 }
  0x5e   :  { %454 = vmatprep.subr.bf16.mxu0 %v615_v0 }
  0x60   :  { %437 = vmatpush3.bf16.msra.mxu1 %v480_v9 }
  0x61   :  { %438 = vmatprep.subr.bf16.mxu1 %v615_v0  ;;  %455 = vmatpush3.bf16.msra.mxu0 %v487_v16 }
  0x62   :  { %456 = vmatprep.subr.bf16.mxu0 %v615_v0 }
  0x64   :  { %439 = vmatpush3.bf16.msra.mxu1 %v481_v10 }
  0x65   :  { %440 = vmatprep.subr.bf16.mxu1 %v615_v0  ;;  %457 = vmatpush3.bf16.msra.mxu0 %v488_v17 }
  0x66   :  { %458 = vmatprep.subr.bf16.mxu0 %v615_v0 }
  0x68   :  { %441 = vmatpush3.bf16.msra.mxu1 %v482_v11 }
  0x69   :  { %459 = vmatpush3.bf16.msra.mxu0 %v489_v26 }
  0x6a   :  { %460 = vmatprep.subr.bf16.mxu0 %v615_v0 }
  0x6d   :  { %461 = vmatpush3.bf16.msra.mxu0 %v490_v27 }
 0x122   :  { %v130_v19 = vpop.f32.mrb[0].mxu0 }
 0x123   :  { %v131_v20 = vadd.f32 %v380_v18, %v130_v19  ;;  %v424_v21 = vpop.f32.mrb[1].mxu0 }
 0x124   :  { %v133_v22 = vpop.f32.mrb[2].mxu0 }
 0x125   :  { %v136_v23 = vmax.f32 %v131_v20, 0.0  ;;  %v425_v24 = vpop.f32.mrb[3].mxu0 }
 0x127   :  { %v137_v25 = vpack.c.bf16 %v136_v23, %v136_v23 }
 0x129   :  { %443 = vmatmul.mubr.bf16.vlgmr.msra.gmra.mrb[0].mxu1 %v137_v25 }
 0x1fc   :  { %v243_v29 = vpop.f32.mrb[0].mxu1 }
 0x1fd   :  { %v244_v30 = vadd.f32 %v382_v28, %v243_v29  ;;  %v444_v31 = vpop.f32.mrb[1].mxu1 }
 0x1fe   :  { %v246_v32 = vpop.f32.mrb[2].mxu1 }
 0x1ff   :  { %v249_v33 = vmax.f32 %v244_v30, 0.0  ;;  %v445_v34 = vpop.f32.mrb[3].mxu1 }
 0x201   :  { %v250_v35 = vpack.c.bf16 %v249_v33, %v249_v33 }
 0x203   :  { %463 = vmatmul.mubr.bf16.vlgmr.msra.gmra.mrb[4].mxu0 %v250_v35 }
 0x2d6   :  { %v356_v37 = vpop.f32.mrb[4].mxu0 }
 0x2d7   :  { %v357_v38 = vadd.f32 %v391_v36, %v356_v37  ;;  %v464_v39 = vpop.f32.mrb[5].mxu0 }
 0x2d8   :  { %v359_v40 = vpop.f32.mrb[6].mxu0 }
 0x2d9   :  { %362 = vst [vmem:[#allocation10] sm:$0xff] %v357_v38  ;;  %v465_v41 = vpop.f32.mrb[7].mxu0 }
 0x2da   :  { %590 = shalt.err (!%p587_p8)
}
 0x2db   :  { %s591_s6 = scalar_lea.hbm %s757_s7, 128 }
 0x2dc   :  { %p592_p9 = scmp.ne.s32.totalorder %s757_s7, %s591_s6  ;;  %p595_p10 = scmp.lt.u32.totalorder %s591_s6, %s757_s7 }
 0x2de   :  { %p597_p11 = pnand %p595_p10, %p592_p9 }
 0x2e0   :  { %600 = shalt.err (!%p597_p11)
}
 0x2e1   :  { %372 = dma.vmem_to_hbm [thread:$0]  %s370_s30, 128, %s757_s7, [#allocation4]  }
 0x2e2   :  { %607 = dma.done.wait [#allocation4], 128  }
 0x2e3   :  { %608 = vsyncadd [#allocation4], 4294967168 }
 0x2e4   :  { %376 = vsyncpa [#allocation3], 1 }
 0x2e5   :  { %377 = vsyncpa [#allocation6], 1 }
 0x2e6   :  { %378 = vsyncpa [#allocation9], 1 }
 0x2e7   :  { %379 = vsyncpa [#allocation4], 1 }

</bundles_post_ra>
